<compile_context>
chip_gen: v7x
topology: tpu7x:2x2x1
jax: 0.10.0
libtpu: 0.0.40
codegen_flags: <defaults>
</compile_context>

<pallas_src>
import functools

import jax
import jax.numpy as jnp
from jax import lax
from jax.experimental import pallas as pl
from jax.experimental.pallas import tpu as pltpu


_LANE = 128
_MiB = 1024 * 1024


def _round_up(x, m):
    return ((x + m - 1) // m) * m


def _sublane_count(dtype):
    itemsize = jnp.dtype(dtype).itemsize
    return max(8, 32 // max(1, itemsize))      # 8 for f32, 16 for bf16, 32 for int8


def _budgets():
    """Per-generation VMEM byte budgets (v5e/v6e: 128 MiB physical; v7x: 64 MiB)."""
    try:
        vmem = int(pltpu.get_tpu_info().vmem_capacity_bytes)
    except Exception:
        vmem = 64 * _MiB                       # conservative (v7x per-core VMEM)
    if vmem >= 96 * _MiB:                      # v5e / v6e
        return {
            "fused_slab_bytes": 16 * _MiB,     # per (C, HW) slab in the fused path
            "stream_buf_bytes": 8 * _MiB,      # per streamed tile in the fallback
            "vmem_limit_bytes": 80 * _MiB,
        }
    # v7x: halved physical VMEM -> smaller slabs + explicit lower scoped limit
    return {
        "fused_slab_bytes": 10 * _MiB,
        "stream_buf_bytes": 6 * _MiB,
        "vmem_limit_bytes": 48 * _MiB,
    }


def _choose_stream_tile_hw(c_pad, hw, itemsize, buf_target_bytes):
    """Largest lane-aligned spatial tile whose (c_pad, tile) buffer fits the byte budget."""
    hw_lanes = _round_up(hw, _LANE)
    cap = (buf_target_bytes // max(1, c_pad * itemsize)) // _LANE * _LANE
    cap = max(_LANE, cap)
    return int(min(hw_lanes, cap))


# --------------------------------------------------------------------------------------
# Fused single-read kernel: pool + squeeze FC + excite FC + sigmoid + scale, per batch n.
# --------------------------------------------------------------------------------------
def _fused_cse_kernel(w1t_ref, w2_ref, x_ref, o_ref, *, inv_hw):
    # w1t_ref: (C, C//2)  Conv_Squeeze weight, transposed
    # w2_ref : (C, C//2)  Conv_Excitation weight
    # x_ref  : (C, HW)    one batch element (native dtype)
    # o_ref  : (C, HW)
    x = x_ref[...]
    mean = jnp.sum(x.astype(jnp.float32), axis=1, keepdims=True) * inv_hw   # (C, 1) f32
    # FC1: z1[o] = sum_c W1[o,c] * mean[c]  (VPU broadcast-mul + sublane reduce)
    z1 = jnp.sum(w1t_ref[...] * mean, axis=0, keepdims=True)                # (1, C//2)
    # FC2: z2[k] = sum_o W2[k,o] * z1[o]
    z2 = jnp.sum(w2_ref[...] * z1, axis=1, keepdims=True)                   # (C, 1)
    gate = jax.nn.sigmoid(z2)                                               # (C, 1) f32
    # Broadcast multiply in the input dtype (bf16 stays bf16; f32 path unchanged).
    o_ref[...] = (x * gate.astype(x.dtype)).astype(o_ref.dtype)


# --------------------------------------------------------------------------------------
# Streaming fallback, pass 1: global-average-pool reduction + FCs + sigmoid -> gate.
# --------------------------------------------------------------------------------------
def _pool_gate_kernel(w1t_ref, w2_ref, x_ref, gate_ref, acc_ref, *, inv_hw, mask_hw):
    # x_ref: (C, TILE_HW) spatial tile; acc_ref: (C, 1) f32 running sum; gate_ref: (C, 1)
    t = pl.program_id(1)
    nt = pl.num_programs(1)

    @pl.when(t == 0)
    def _():
        acc_ref[...] = jnp.zeros_like(acc_ref)

    x = x_ref[...].astype(jnp.float32)
    if mask_hw is not None:
        # Ragged last tile: out-of-range lanes hold unspecified data -> zero them.
        tile_hw = x.shape[-1]
        col = lax.broadcasted_iota(jnp.int32, x.shape, 1)
        valid = jnp.minimum(mask_hw - t * tile_hw, tile_hw)     # == tile_hw except last tile
        x = jnp.where(col < valid, x, 0.0)
    acc_ref[...] += jnp.sum(x, axis=1, keepdims=True)           # (C, 1)

    @pl.when(t == nt - 1)
    def _():
        mean = acc_ref[...] * inv_hw                            # true-HW mean
        z1 = jnp.sum(w1t_ref[...] * mean, axis=0, keepdims=True)
        z2 = jnp.sum(w2_ref[...] * z1, axis=1, keepdims=True)
        gate_ref[...] = jax.nn.sigmoid(z2)


# --------------------------------------------------------------------------------------
# Streaming fallback, pass 2: out = U * gate.
# --------------------------------------------------------------------------------------
def _scale_kernel(gate_ref, x_ref, o_ref):
    x = x_ref[...]
    o_ref[...] = (x * gate_ref[...].astype(x.dtype)).astype(o_ref.dtype)


def cse_forward(U, w_squeeze, w_excite, *, force_streaming=False, stream_tile_hw=None):
    """cSE forward.

    U:         (N, C, H, W)
    w_squeeze: (C//2, C, 1, 1)  Conv2d(C,   C//2, 1, bias=False) weight
    w_excite:  (C, C//2, 1, 1)  Conv2d(C//2, C,   1, bias=False) weight
    """
    N, C, H, W = U.shape
    C_half = w_squeeze.shape[0]
    HW = H * W
    itemsize = jnp.dtype(U.dtype).itemsize

    w1t = w_squeeze.reshape(C_half, C).T.astype(jnp.float32)   # (C, C//2)
    w2 = w_excite.reshape(C, C_half).astype(jnp.float32)       # (C, C//2)

    x = U.reshape(N, C, HW)                                    # free metadata reshape

    budgets = _budgets()
    c_pad = _round_up(C, _sublane_count(U.dtype))
    slab_bytes = c_pad * _round_up(HW, _LANE) * itemsize

    # ---- Fast path: whole (C, HW) slab per batch element fits VMEM -> one read of U.
    if (not force_streaming) and slab_bytes <= budgets["fused_slab_bytes"]:
        out = pl.pallas_call(
            functools.partial(_fused_cse_kernel, inv_hw=1.0 / HW),
            out_shape=jax.ShapeDtypeStruct((N, C, HW), U.dtype),
            grid_spec=pltpu.PrefetchScalarGridSpec(
                num_scalar_prefetch=0,
                grid=(N,),
                in_specs=[
                    pl.BlockSpec((C, C_half), lambda n: (0, 0)),               # w1t
                    pl.BlockSpec((C, C_half), lambda n: (0, 0)),               # w2
                    pl.BlockSpec((pl.Squeezed(), C, HW), lambda n: (n, 0, 0)),  # x slab
                ],
                out_specs=pl.BlockSpec((pl.Squeezed(), C, HW), lambda n: (n, 0, 0)),
            ),
            compiler_params=pltpu.CompilerParams(
                dimension_semantics=("parallel",),
                vmem_limit_bytes=budgets["vmem_limit_bytes"],
            ),
        )(w1t, w2, x)
        return out.reshape(N, C, H, W)

    # ---- Streaming fallback: two passes over U, spatially tiled, no host pad/slice.
    if stream_tile_hw is None:
        tile_hw = _choose_stream_tile_hw(c_pad, HW, itemsize, budgets["stream_buf_bytes"])
    else:
        tile_hw = int(stream_tile_hw)
    n_tiles = -(-HW // tile_hw)
    ragged = (n_tiles * tile_hw != HW)
    mask_hw = HW if ragged else None

    # Pass 1: global average pool (reduction over HW tiles) + FCs + sigmoid -> gate.
    gate = pl.pallas_call(
        functools.partial(_pool_gate_kernel, inv_hw=1.0 / HW, mask_hw=mask_hw),
        out_shape=jax.ShapeDtypeStruct((N, C, 1), jnp.float32),
        grid_spec=pltpu.PrefetchScalarGridSpec(
            num_scalar_prefetch=0,
            grid=(N, n_tiles),
            in_specs=[
                pl.BlockSpec((C, C_half), lambda n, t: (0, 0)),                    # w1t
                pl.BlockSpec((C, C_half), lambda n, t: (0, 0)),                    # w2
                pl.BlockSpec((pl.Squeezed(), C, tile_hw), lambda n, t: (n, 0, t)),  # x tile
            ],
            out_specs=pl.BlockSpec((pl.Squeezed(), C, 1), lambda n, t: (n, 0, 0)),
            scratch_shapes=[pltpu.VMEM((C, 1), jnp.float32)],
        ),
        compiler_params=pltpu.CompilerParams(
            dimension_semantics=("parallel", "arbitrary"),   # HW axis is a reduction
            vmem_limit_bytes=budgets["vmem_limit_bytes"],
        ),
    )(w1t, w2, x)

    # Pass 2: out = U * gate (broadcast over spatial), fully parallel.
    out = pl.pallas_call(
        _scale_kernel,
        out_shape=jax.ShapeDtypeStruct((N, C, HW), U.dtype),
        grid_spec=pltpu.PrefetchScalarGridSpec(
            num_scalar_prefetch=0,
            grid=(N, n_tiles),
            in_specs=[
                pl.BlockSpec((pl.Squeezed(), C, 1), lambda n, t: (n, 0, 0)),        # gate
                pl.BlockSpec((pl.Squeezed(), C, tile_hw), lambda n, t: (n, 0, t)),  # x tile
            ],
            out_specs=pl.BlockSpec((pl.Squeezed(), C, tile_hw), lambda n, t: (n, 0, t)),
        ),
        compiler_params=pltpu.CompilerParams(
            dimension_semantics=("parallel", "parallel"),
            vmem_limit_bytes=budgets["vmem_limit_bytes"],
        ),
    )(gate, x)
    return out.reshape(N, C, H, W)


# --------------------------------------------------------------------------------------
# Self test
# --------------------------------------------------------------------------------------
def _reference(U, w_squeeze, w_excite):
    N, C, H, W = U.shape
    C_half = w_squeeze.shape[0]
    Uf = U.astype(jnp.float32)
    z = jnp.mean(Uf, axis=(2, 3))                                  # (N, C)
    z1 = z @ w_squeeze.reshape(C_half, C).T.astype(jnp.float32)    # (N, C//2)
    z2 = z1 @ w_excite.reshape(C, C_half).T.astype(jnp.float32)    # (N, C)
    gate = jax.nn.sigmoid(z2)[:, :, None, None]                    # (N, C, 1, 1)
    return Uf * gate


def _run_case(key, N, C, H, W, dtype, atol, rtol, label, **kw):
    k_u, k_w1, k_w2 = jax.random.split(key, 3)
    C_half = C // 2
    U = jax.random.normal(k_u, (N, C, H, W), dtype=jnp.float32).astype(dtype)
    w_squeeze = (jax.random.uniform(k_w1, (C_half, C, 1, 1), dtype=jnp.float32) - 0.5) * 0.5
    w_excite = (jax.random.uniform(k_w2, (C, C_half, 1, 1), dtype=jnp.float32) - 0.5) * 0.5

    out = jax.block_until_ready(cse_forward(U, w_squeeze, w_excite, **kw))
    ref = _reference(U, w_squeeze, w_excite)

    assert out.shape == U.shape, f"{label}: shape mismatch {out.shape} vs {U.shape}"
    assert out.dtype == U.dtype, f"{label}: dtype mismatch {out.dtype} vs {U.dtype}"
    assert jnp.allclose(out.astype(jnp.float32), ref, atol=atol, rtol=rtol), (
        f"{label}: mismatch vs reference"
    )


if __name__ == "__main__":
    root = jax.random.PRNGKey(0)
    k1, k2, k3, k4 = jax.random.split(root, 4)

    # 1) Fused single-read path, lane-aligned spatial (HW = 256).
    _run_case(k1, 2, 4, 16, 16, jnp.float32, 1e-5, 1e-5, "fused/f32/aligned")

    # 2) Fused path with ragged spatial extent (HW = 225, not a multiple of 128).
    _run_case(k2, 2, 4, 15, 15, jnp.float32, 1e-5, 1e-5, "fused/f32/ragged")

    # 3) Streaming fallback, multi-tile with ragged (masked) last tile — no host pad/slice.
    _run_case(k3, 2, 4, 15, 15, jnp.float32, 1e-5, 1e-5, "stream/f32/ragged",
              force_streaming=True, stream_tile_hw=128)

    # 4) bf16 input on the fused path (multiply done in bf16, pooling/FCs in f32).
    _run_case(k4, 2, 16, 16, 16, jnp.bfloat16, 5e-2, 5e-2, "fused/bf16/aligned")

    print("KERNEL_OK")
</pallas_src>

<mosaic_0001>
module attributes {stable_mosaic.version = 11 : i64} {
  func.func @_fused_cse_kernel(%arg0: i32, %arg1: memref<4x2xf32, #tpu.memory_space<vmem>>, %arg2: memref<4x2xf32, #tpu.memory_space<vmem>>, %arg3: memref<1x4x256xf32, #tpu.memory_space<vmem>>, %arg4: memref<1x4x256xf32, #tpu.memory_space<vmem>>) attributes {dimension_semantics = [#tpu.dimension_semantics<parallel>], iteration_bounds = array<i64: 2>, scalar_prefetch = 0 : i64, scratch_operands = 0 : i64, tpu.core_type = #tpu.core_type<tc>, window_params = [{pipeline_mode = #tpu.pipeline_mode<synchronous>, transform_indices = @transform_0, window_bounds = array<i64: 4, 2>}, {pipeline_mode = #tpu.pipeline_mode<synchronous>, transform_indices = @transform_1, window_bounds = array<i64: 4, 2>}, {transform_indices = @transform_2, window_bounds = array<i64: 1, 4, 256>}, {transform_indices = @transform_3, window_bounds = array<i64: 1, 4, 256>}]} {
    %c0 = arith.constant 0 : index
    %c0_0 = arith.constant 0 : index
    %c0_1 = arith.constant 0 : index
    %0 = vector.load %arg3[%c0, %c0_0, %c0_1] : memref<1x4x256xf32, #tpu.memory_space<vmem>>, vector<1x4x256xf32>
    %1 = vector.shape_cast %0 : vector<1x4x256xf32> to vector<4x256xf32>
    %cst = arith.constant dense<0.000000e+00> : vector<4xf32>
    %2 = vector.multi_reduction <add>, %1, %cst [1] : vector<4x256xf32> to vector<4xf32>
    %3 = vector.shape_cast %2 : vector<4xf32> to vector<4x1xf32>
    %cst_2 = arith.constant 3.906250e-03 : f32
    %4 = vector.broadcast %cst_2 : f32 to vector<4x1xf32>
    %5 = arith.mulf %3, %4 : vector<4x1xf32>
    %c0_3 = arith.constant 0 : index
    %c0_4 = arith.constant 0 : index
    %6 = vector.load %arg1[%c0_3, %c0_4] : memref<4x2xf32, #tpu.memory_space<vmem>>, vector<4x2xf32>
    %7 = vector.broadcast %5 : vector<4x1xf32> to vector<4x2xf32>
    %8 = arith.mulf %6, %7 : vector<4x2xf32>
    %cst_5 = arith.constant dense<0.000000e+00> : vector<2xf32>
    %9 = vector.multi_reduction <add>, %8, %cst_5 [0] : vector<4x2xf32> to vector<2xf32>
    %10 = vector.shape_cast %9 : vector<2xf32> to vector<1x2xf32>
    %c0_6 = arith.constant 0 : index
    %c0_7 = arith.constant 0 : index
    %11 = vector.load %arg2[%c0_6, %c0_7] : memref<4x2xf32, #tpu.memory_space<vmem>>, vector<4x2xf32>
    %12 = vector.broadcast %10 : vector<1x2xf32> to vector<4x2xf32>
    %13 = arith.mulf %11, %12 : vector<4x2xf32>
    %cst_8 = arith.constant dense<0.000000e+00> : vector<4xf32>
    %14 = vector.multi_reduction <add>, %13, %cst_8 [1] : vector<4x2xf32> to vector<4xf32>
    %15 = vector.shape_cast %14 : vector<4xf32> to vector<4x1xf32>
    %16 = arith.negf %15 : vector<4x1xf32>
    %17 = math.exp %16 : vector<4x1xf32>
    %cst_9 = arith.constant 1.000000e+00 : f32
    %18 = vector.broadcast %cst_9 : f32 to vector<4x1xf32>
    %19 = arith.addf %18, %17 : vector<4x1xf32>
    %20 = arith.divf %18, %19 : vector<4x1xf32>
    %21 = vector.broadcast %20 : vector<4x1xf32> to vector<4x256xf32>
    %22 = arith.mulf %1, %21 : vector<4x256xf32>
    %c0_10 = arith.constant 0 : index
    %c0_11 = arith.constant 0 : index
    %c0_12 = arith.constant 0 : index
    %23 = vector.load %arg4[%c0_10, %c0_11, %c0_12] : memref<1x4x256xf32, #tpu.memory_space<vmem>>, vector<1x4x256xf32>
    %24 = vector.shape_cast %23 : vector<1x4x256xf32> to vector<4x256xf32>
    %25 = vector.shape_cast %22 : vector<4x256xf32> to vector<1x4x256xf32>
    tpu.vector_store %arg4[%c0_10, %c0_11, %c0_12], %25 {strides = array<i32>} : memref<1x4x256xf32, #tpu.memory_space<vmem>>, vector<1x4x256xf32>,
    return
  }
  func.func @transform_0(%arg0: i32) -> (i32, i32) {
    %c0_i32 = arith.constant 0 : i32
    %c0_i32_0 = arith.constant 0 : i32
    %c0_i32_1 = arith.constant 0 : i32
    return %c0_i32, %c0_i32_0 : i32, i32
  }
  func.func @transform_1(%arg0: i32) -> (i32, i32) {
    %c0_i32 = arith.constant 0 : i32
    %c0_i32_0 = arith.constant 0 : i32
    %c0_i32_1 = arith.constant 0 : i32
    return %c0_i32, %c0_i32_0 : i32, i32
  }
  func.func @transform_2(%arg0: i32) -> (i32, i32, i32) {
    %c0_i32 = arith.constant 0 : i32
    %c0_i32_0 = arith.constant 0 : i32
    %c0_i32_1 = arith.constant 0 : i32
    return %arg0, %c0_i32, %c0_i32_0 : i32, i32, i32
  }
  func.func @transform_3(%arg0: i32) -> (i32, i32, i32) {
    %c0_i32 = arith.constant 0 : i32
    %c0_i32_0 = arith.constant 0 : i32
    %c0_i32_1 = arith.constant 0 : i32
    return %arg0, %c0_i32, %c0_i32_0 : i32, i32, i32
  }
}

</mosaic_0001>

<bundles_post_ra>
// kernel: tpu_custom_call.1
= control target key start
LH: loop header
LB: loop body
LE: loop exit
PB: predicated region body
PF: predicated region fallthrough
CT: control target
= control target key end

     0   :  { %8 = vsyncpa [#allocation3], 0  ;;  %s538_s0 = inlined_call_operand.vmem [shape: f32[4,2], index: 0, kind: input, shape index: {}]   ;;  %s539_s1 = inlined_call_operand.vmem [shape: f32[4,2], index: 1, kind: input, shape index: {}]   ;;  %s540_s2 = inlined_call_operand.vmem [shape: f32[2,4,256], index: 2, kind: input, shape index: {}]   ;;  %s541_s3 = inlined_call_operand.hbm [shape: f32[2,4,256], index: 3, kind: output, shape index: {}]  }
   0x1   :  { %10 = vsyncpa [#allocation3 + $0x1], 0  ;;  %s432_s12 = smov 0   ;;  %s434_s13 = smov 0  }
   0x2   :  { %s436_s14 = smov 0   ;;  %s438_s15 = smov 0  }
   0x3 LB: > { %s453_s16 = sadd.s32 4294967295, %s408_s15   ;;  %s286_s17 = sadd.s32 4294967294, %s408_s15   ;;  %s408_s15 = sphi %s438_s15, %s547_s15   ;;  %s404_s14 = sphi %s436_s14, %s546_s14   ;;  %s400_s13 = sphi %s434_s13, %s545_s13   ;;  %s396_s12 = sphi %s432_s12, %s544_s12  }
   0x4   : > { %s457_s18 = sadd.s32 1, %s408_s15   ;;  %s91_s19 = sadd.s32 1, %s404_s14 }
   0x5   : > { %s88_s20 = ssub.s32 %s408_s15, %s457_s18  ;;  %p101_p0 = scmp.ne.s32.totalorder %s404_s14, %s400_s13 }
   0x6   : > { %p89_p1 = scmp.eq.s32.totalorder %s88_s20, 0  ;;  %p102_p2 = scmp.eq.s32.totalorder %s453_s16, 1 }
   0x7   : > { %p107_p3 = scmp.ne.s32.totalorder %s400_s13, %s396_s12  ;;  %p108_p4 = scmp.eq.s32.totalorder %s286_s17, 1 }
   0x8   : > { %s468_s21 = scalar_select %p89_p1, %s404_s14, %s91_s19  }
   0x9   : > { %p470_p5 = por %p102_p2, %p101_p0  ;;  %p474_p6 = por %p108_p4, %p107_p3 }
   0xa   : > { %p289_p7 = scmp.ge.s32.totalorder %s408_s15, 1  ;;  %p140_p8 = scmp.lt.s32.totalorder %s408_s15, 3 }
   0xc   : > { %p141_p9 = pnand %p289_p7, %p140_p8 }
   0xd   : > { %p164_p10 = scmp.lt.s32.totalorder (!%p141_p9), %s453_s16, 1  ;;  %vm173_vm0 = vcmask (!%p141_p9), 1043456   ;;  %v180_v5 = vld [vmem:[%s538_s0] sm:$0xf] (!%p141_p9)  ;;  %vm182_vm1 = vcmask (!%p141_p9), 11264   ;;  %v205_v25 = vlaneseq (!%p141_p9)  ;;  %s161_s6 = sand.u32 (!%p141_p9), 1, %s400_s13  }
   0xe   : > { %144 = sbr.rel (%p141_p9) target bundleno = 379 (0x17b), region = 32  ;;  %v190_v15 = vld [vmem:[%s539_s1] sm:$0xf] (!%p141_p9)  ;;  %v410_v23 = vmov (!%p141_p9), 839922192   ;;  %s290_s7 = sshll.u32 (!%p141_p9), %s161_s6, 3 }
   0xf   : > { %v203_v24 = vunpack.c.l.s4 (!%p141_p9), %v410_v23  ;;  %v206_v27 = vshrl.u32 (!%p141_p9), %v205_v25, 7  ;;  %s300_s8 = sshll.u32 (!%p141_p9), %s453_s16, 7  ;;  %s163_s9 = scalar_lea.vmem (!%p141_p9), [#allocation2], %s290_s7 }
  0x10   : > { %s227_s10 = sshll.u32 (!%p141_p9), %s163_s9, 4  ;;  %s496_s19 = scalar_lea.hbm (!%p141_p9), %s541_s3, %s300_s8  ;;  %s498_s10 = int_to_ptr.vmem [resolvable:$true] %s227_s10 }
  0x11   : > { %v204_v26 = vunpack.c.0.s8 (!%p141_p9), %v203_v24  ;;  %s213_s20 = scalar_lea.sflag (!%p141_p9), [#allocation3], %s161_s6 }
  0x13   : > { %v207_v28 = vsub.s32 (!%p141_p9), %v204_v26, %v206_v27 }
  0x15   : > { %s165_s24 = scalar_select %p164_p10, %s453_s16, 1 }
  0x16   : > { %s411_s16 = smov [#allocation2]  }
  0x17   : > { %s299_s25 = sshll.u32 %s165_s24, 3  ;;  %s346_s24 = scalar_lea.vmem %s498_s10, 128 }
  0x18   : > { %s168_s28 = scalar_lea.vmem %s540_s2, %s299_s25  ;;  %p347_p11 = scmp.ne.s32.totalorder %s498_s10, %s346_s24 }
  0x19   : > { %v169_v0 = vld [vmem:[%s168_s28] sm:$0xff]  ;;  %s350_s25 = sshll.u32 %s411_s16, 4  ;;  %s351_s25 = int_to_ptr.vmem [resolvable:$false] %s350_s25 }
  0x1a   : > { %v171_v1 = vcombine.high %v169_v0, %v169_v0  ;;  %v174_v2 = vsel %vm173_vm0, %v169_v0, 0.0  ;;  %p348_p12 = pnand %p347_p11, %p470_p5  ;;  %s352_s26 = scalar_lea.vmem %s351_s25, 256 }
  0x1b   : > { %p353_p0 = scmp.lt.s32.totalorder %s498_s10, %s351_s25  ;;  %p354_p1 = scmp.lt.s32.totalorder %s352_s26, %s346_s24 }
  0x1c   : > { %v175_v3 = vsel %vm173_vm0, %v171_v1, 0.0  ;;  %p349_p13 = pneg %p348_p12 }
  0x1d   : > { %v176_v4 = vadd.f32 %v175_v3, %v174_v2  ;;  %p355_p2 = por %p354_p1, %p353_p0 }
  0x1f   : > { %177 = vadd.xlane.f32.xlu0 %v176_v4  ;;  %p356_p3 = pnand %p355_p2, %p349_p13 }
  0xac   : > { %v178_v6 = vpop.xlane.xlu0 %177 }
  0xad   : > { %v179_v7 = vmul.f32 0.00390625, %v178_v6 }
  0xaf   : > { %v181_v8 = vmul.f32 %v180_v5, %v179_v7 }
  0xb1   : > { %v183_v9 = vsel %vm182_vm1, %v181_v8, 0.0 }
  0xb2   : > { %v184_v10 = vrot.slane %v183_v9, 4 }
  0xb4   : > { %v185_v11 = vadd.f32 %v184_v10, %v183_v9 }
  0xb6   : > { %v186_v12 = vrot.slane %v185_v11, 2 }
  0xb8   : > { %v187_v13 = vadd.f32 %v186_v12, %v185_v11 }
  0xba   : > { %v188_v14 = vrot.slane %v187_v13, 1 }
  0xbc   : > { %v189_v16 = vadd.f32 %v188_v14, %v187_v13 }
  0xbe   : > { %v191_v17 = vmul.f32 %v190_v15, %v189_v16 }
  0xc0   : > { %v192_v18 = vsel %vm182_vm1, %v191_v17, 0.0 }
  0xc1   : > { %193 = vadd.xlane.f32.xlu0 %v192_v18 }
 0x14e   : > { %v194_v19 = vpop.xlane.xlu0 %193 }
 0x14f   : > { %v293_v20 = vmul.f32 -1.442695, %v194_v19 }
 0x151   : > { %342 = vpow2.f32 %v293_v20 }
 0x15b   : > { %v343_v21 = vpop.eup %342 }
 0x15c   : > { %v198_v22 = vadd.f32 1.0, %v343_v21 }
 0x15e   : > { %344 = vrcp.f32 %v198_v22 }
 0x168   : > { %v345_v29 = vpop.eup %344 }
 0x169   : > { %v208_v30 = vrot.slane %v345_v29, %v207_v28 }
 0x16b   : > { %v210_v31 = vmul.f32 %v208_v30, %v169_v0 }
 0x16d   : > { %211 = vst [vmem:[%s163_s9] sm:$0xff] %v210_v31 }
 0x16e   : > { %359 = shalt.err (!%p356_p3)
}
 0x16f   : > { %s360_s27 = scalar_lea.hbm %s496_s19, 128  ;;  %s364_s30 = scalar_lea.hbm %s541_s3, 256 }
 0x170   : > { %p361_p4 = scmp.ne.s32.totalorder %s496_s19, %s360_s27  ;;  %p365_p9 = scmp.lt.u32.totalorder %s496_s19, %s541_s3 }
 0x171   : > { %p366_p10 = scmp.lt.u32.totalorder %s364_s30, %s360_s27  ;;  %p368_p12 = scmp.lt.u32.totalorder %s360_s27, %s496_s19 }
 0x172   : > { %p362_p7 = pnand %p361_p4, %p470_p5 }
 0x173   : > { %p367_p11 = por %p366_p10, %p365_p9 }
 0x174   : > { %p363_p8 = pneg %p362_p7 }
 0x175   : > { %p369_p13 = por %p368_p12, %p367_p11 }
 0x177   : > { %p370_p0 = pnand %p369_p13, %p363_p8 }
 0x179   : > { %373 = shalt.err (!%p370_p0)
}
 0x17a   : > { %301 = dma.vmem_to_hbm [thread:$0]  (%p470_p5), %s498_s10, 128, %s496_s19, %s213_s20  }
 0x17b PF: > { %p307_p1 = scmp.ge.s32.totalorder %s408_s15, 2  ;;  %s239_s6 = sand.u32 1, %s396_s12  }
 0x17c   : > { %s240_s7 = scalar_lea.sflag [#allocation3], %s239_s6 }
 0x17d   : > { %p304_p2 = pnand %p307_p1, %p474_p6 }
 0x17f   : > { %391 = dma.done.wait (!%p304_p2), %s240_s7, 128  }
 0x180   : > { %393 = vsyncadd (!%p304_p2), %s240_s7, 4294967168  ;;  %p13_p3 = scmp.ge.s32.totalorder %s457_s18, 4   ;;  %s544_s12 = smov %s400_s13 }
 0x181   : > { %s545_s13 = smov %s404_s14  ;;  %s546_s14 = smov %s468_s21 }
 0x182   : > { %s547_s15 = smov %s457_s18  ;;  %15 = sbr.rel (!%p13_p3) target bundleno = 3 (0x3), region = 67 }
 0x189   :  { %245 = vsyncpa [#allocation3], 1 }
 0x18a   :  { %247 = vsyncpa [#allocation3 + $0x1], 1 }

</bundles_post_ra>
